<compile_context>
chip_gen: v5e
topology: v5e:2x2
jax: 0.10.0
libtpu: 0.0.40
codegen_flags: <defaults>
</compile_context>

<pallas_src>
import functools

import jax
import jax.numpy as jnp
from jax.experimental import pallas as pl
from jax.experimental.pallas import tpu as pltpu

D_MODEL = 768
LN_EPS = 1e-05


def _round_up(x: int, m: int) -> int:
    return ((x + m - 1) // m) * m


def layernorm_kernel(x_ref, w_ref, b_ref, o_ref, *, eps, inv_d):
    # x_ref: (row_tile, d_model) in VMEM; w_ref/b_ref: (1, d_model) f32.
    x = x_ref[...].astype(jnp.float32)
    # Fused single pass over x: both reductions reuse the same loaded vregs.
    s = jnp.sum(x, axis=-1, keepdims=True)
    ss = jnp.sum(x * x, axis=-1, keepdims=True)
    mean = s * inv_d
    # Biased variance (unbiased=False), matching PyTorch LayerNorm.
    # Clamp at 0 to guard against tiny negative values from cancellation.
    var = jnp.maximum(ss * inv_d - mean * mean, 0.0)
    inv_std = jax.lax.rsqrt(var + eps)
    out = (x - mean) * inv_std * w_ref[...] + b_ref[...]
    o_ref[...] = out.astype(o_ref.dtype)


def layernorm(residual, w, b, *, eps=LN_EPS, row_tile=None):
    """residual: [batch, posn, d_model]; w, b: [d_model]."""
    batch, posn, d_model = residual.shape
    rows = batch * posn

    x2d = residual.reshape(rows, d_model)
    # Hoist the f32 cast of the (tiny) scale/shift params out of the kernel.
    w2d = w.astype(jnp.float32).reshape(1, d_model)
    b2d = b.astype(jnp.float32).reshape(1, d_model)

    # Dtype-aware sublane multiple: 32-bit -> 8, 16-bit -> 16, 8-bit -> 32.
    itemsize = jnp.dtype(residual.dtype).itemsize
    sublane = max(8, 32 // itemsize)

    # Dtype-aware default tile: keep per-tile HBM traffic roughly constant.
    if row_tile is None:
        row_tile = 2048 if itemsize >= 4 else 4096

    # Tile selection:
    #  * never exceed the requested max,
    #  * for small inputs aim for >= ~4 grid steps (2x v7x's TC count) so the
    #    "parallel" axis actually gives megacore sharding something to split,
    #  * stay sublane-aligned and never (much) larger than the input.
    quarter = _round_up(max(1, -(-rows // 4)), sublane)
    tile = min(row_tile, quarter, _round_up(rows, sublane))
    tile = max(tile, sublane)

    # Ragged last block: no padding, no post-slice. Pallas masks the boundary
    # store; each row is independent so padded-tail garbage never leaks.
    grid = (pl.cdiv(rows, tile),)

    # VMEM budget: double-buffered input + output tiles, f32 intermediates
    # inside the kernel, resident w/b, plus compiler-scratch headroom.
    in_tile_bytes = tile * d_model * itemsize
    vmem_bytes = 4 * in_tile_bytes            # 2x in + 2x out buffers
    vmem_bytes += 2 * tile * d_model * 4      # f32 temporaries in the body
    vmem_bytes += 2 * d_model * 4             # resident w/b
    vmem_bytes += 4 << 20                     # headroom
    # Cap well under v7x's 64 MiB physical VMEM per TensorCore.
    vmem_bytes = int(min(max(vmem_bytes, 16 << 20), 52 << 20))

    out2d = pl.pallas_call(
        functools.partial(layernorm_kernel, eps=eps, inv_d=1.0 / d_model),
        out_shape=jax.ShapeDtypeStruct((rows, d_model), residual.dtype),
        grid_spec=pltpu.PrefetchScalarGridSpec(
            num_scalar_prefetch=0,
            grid=grid,
            in_specs=[
                # If a v7x profile shows exposed DMA, add
                # pipeline_mode=pl.Buffered(3) here (input only).
                pl.BlockSpec((tile, d_model), lambda i: (i, 0)),
                pl.BlockSpec((1, d_model), lambda i: (0, 0)),
                pl.BlockSpec((1, d_model), lambda i: (0, 0)),
            ],
            out_specs=pl.BlockSpec((tile, d_model), lambda i: (i, 0)),
        ),
        compiler_params=pltpu.CompilerParams(
            # Purely row-parallel: lets megacore (v7x 2-TC) shard the grid.
            dimension_semantics=("parallel",),
            vmem_limit_bytes=vmem_bytes,
        ),
    )(x2d, w2d, b2d)

    return out2d.reshape(batch, posn, d_model)


def _reference(x, w, b, eps=LN_EPS):
    mean = jnp.mean(x, axis=-1, keepdims=True)
    var = jnp.mean((x - mean) ** 2, axis=-1, keepdims=True)
    return (x - mean) / jnp.sqrt(var + eps) * w + b


if __name__ == "__main__":
    key = jax.random.PRNGKey(0)
    batch, posn = 2, 8
    x = jax.random.normal(key, (batch, posn, D_MODEL), dtype=jnp.float32)

    # Deterministic parameter init matching nn.Parameter(ones)/nn.Parameter(zeros)
    w = jnp.ones((D_MODEL,), dtype=jnp.float32)
    b = jnp.zeros((D_MODEL,), dtype=jnp.float32)

    out = jax.block_until_ready(layernorm(x, w, b))
    ref = _reference(x, w, b)
    assert jnp.allclose(out, ref, atol=1e-5, rtol=1e-5), "mismatch vs reference"

    # Exercise the ragged-last-block (masked boundary store) path: 3*37 = 111
    # rows, not a multiple of the tile, with no wrapper padding.
    x2 = jax.random.normal(jax.random.PRNGKey(1), (3, 37, D_MODEL), dtype=jnp.float32)
    out2 = jax.block_until_ready(layernorm(x2, w, b))
    ref2 = _reference(x2, w, b)
    assert jnp.allclose(out2, ref2, atol=1e-5, rtol=1e-5), "mismatch vs reference (ragged)"

    print("KERNEL_OK")
</pallas_src>

<mosaic_0001>
module attributes {stable_mosaic.version = 11 : i64} {
  func.func @layernorm_kernel(%arg0: i32, %arg1: memref<8x768xf32, #tpu.memory_space<vmem>>, %arg2: memref<1x768xf32, #tpu.memory_space<vmem>>, %arg3: memref<1x768xf32, #tpu.memory_space<vmem>>, %arg4: memref<8x768xf32, #tpu.memory_space<vmem>>) attributes {dimension_semantics = [#tpu.dimension_semantics<parallel>], iteration_bounds = array<i64: 2>, scalar_prefetch = 0 : i64, scratch_operands = 0 : i64, tpu.core_type = #tpu.core_type<tc>, window_params = [{transform_indices = @transform_0, window_bounds = array<i64: 8, 768>}, {pipeline_mode = #tpu.pipeline_mode<synchronous>, transform_indices = @transform_1, window_bounds = array<i64: 1, 768>}, {pipeline_mode = #tpu.pipeline_mode<synchronous>, transform_indices = @transform_2, window_bounds = array<i64: 1, 768>}, {transform_indices = @transform_3, window_bounds = array<i64: 8, 768>}]} {
    %c0 = arith.constant 0 : index
    %c0_0 = arith.constant 0 : index
    %0 = vector.load %arg1[%c0, %c0_0] : memref<8x768xf32, #tpu.memory_space<vmem>>, vector<8x768xf32>
    %cst = arith.constant dense<0.000000e+00> : vector<8xf32>
    %1 = vector.multi_reduction <add>, %0, %cst [1] : vector<8x768xf32> to vector<8xf32>
    %2 = vector.shape_cast %1 : vector<8xf32> to vector<8x1xf32>
    %3 = arith.mulf %0, %0 : vector<8x768xf32>
    %cst_1 = arith.constant dense<0.000000e+00> : vector<8xf32>
    %4 = vector.multi_reduction <add>, %3, %cst_1 [1] : vector<8x768xf32> to vector<8xf32>
    %5 = vector.shape_cast %4 : vector<8xf32> to vector<8x1xf32>
    %cst_2 = arith.constant 0.00130208337 : f32
    %6 = vector.broadcast %cst_2 : f32 to vector<8x1xf32>
    %7 = arith.mulf %2, %6 : vector<8x1xf32>
    %cst_3 = arith.constant 0.00130208337 : f32
    %8 = vector.broadcast %cst_3 : f32 to vector<8x1xf32>
    %9 = arith.mulf %5, %8 : vector<8x1xf32>
    %10 = arith.mulf %7, %7 : vector<8x1xf32>
    %11 = arith.subf %9, %10 : vector<8x1xf32>
    %cst_4 = arith.constant 0.000000e+00 : f32
    %12 = vector.broadcast %cst_4 : f32 to vector<8x1xf32>
    %13 = arith.maximumf %11, %12 : vector<8x1xf32>
    %cst_5 = arith.constant 9.99999974E-6 : f32
    %14 = vector.broadcast %cst_5 : f32 to vector<8x1xf32>
    %15 = arith.addf %13, %14 : vector<8x1xf32>
    %16 = math.rsqrt %15 : vector<8x1xf32>
    %17 = vector.broadcast %7 : vector<8x1xf32> to vector<8x768xf32>
    %18 = arith.subf %0, %17 : vector<8x768xf32>
    %19 = vector.broadcast %16 : vector<8x1xf32> to vector<8x768xf32>
    %20 = arith.mulf %18, %19 : vector<8x768xf32>
    %c0_6 = arith.constant 0 : index
    %c0_7 = arith.constant 0 : index
    %21 = vector.load %arg2[%c0_6, %c0_7] : memref<1x768xf32, #tpu.memory_space<vmem>>, vector<1x768xf32>
    %22 = vector.broadcast %21 : vector<1x768xf32> to vector<8x768xf32>
    %23 = arith.mulf %20, %22 : vector<8x768xf32>
    %c0_8 = arith.constant 0 : index
    %c0_9 = arith.constant 0 : index
    %24 = vector.load %arg3[%c0_8, %c0_9] : memref<1x768xf32, #tpu.memory_space<vmem>>, vector<1x768xf32>
    %25 = vector.broadcast %24 : vector<1x768xf32> to vector<8x768xf32>
    %26 = arith.addf %23, %25 : vector<8x768xf32>
    %c0_10 = arith.constant 0 : index
    %c0_11 = arith.constant 0 : index
    %27 = vector.load %arg4[%c0_10, %c0_11] : memref<8x768xf32, #tpu.memory_space<vmem>>, vector<8x768xf32>
    tpu.vector_store %arg4[%c0_10, %c0_11], %26 {strides = array<i32>} : memref<8x768xf32, #tpu.memory_space<vmem>>, vector<8x768xf32>,
    return
  }
  func.func @transform_0(%arg0: i32) -> (i32, i32) {
    %c0_i32 = arith.constant 0 : i32
    %c0_i32_0 = arith.constant 0 : i32
    return %arg0, %c0_i32 : i32, i32
  }
  func.func @transform_1(%arg0: i32) -> (i32, i32) {
    %c0_i32 = arith.constant 0 : i32
    %c0_i32_0 = arith.constant 0 : i32
    %c0_i32_1 = arith.constant 0 : i32
    return %c0_i32, %c0_i32_0 : i32, i32
  }
  func.func @transform_2(%arg0: i32) -> (i32, i32) {
    %c0_i32 = arith.constant 0 : i32
    %c0_i32_0 = arith.constant 0 : i32
    %c0_i32_1 = arith.constant 0 : i32
    return %c0_i32, %c0_i32_0 : i32, i32
  }
  func.func @transform_3(%arg0: i32) -> (i32, i32) {
    %c0_i32 = arith.constant 0 : i32
    %c0_i32_0 = arith.constant 0 : i32
    return %arg0, %c0_i32 : i32, i32
  }
}

</mosaic_0001>

<bundles_post_ra>
// kernel: tpu_custom_call.1
= control target key start
LH: loop header
LB: loop body
LE: loop exit
PB: predicated region body
PF: predicated region fallthrough
CT: control target
= control target key end

     0   :  { %8 = vsyncpa [#allocation3], 0  ;;  %s838_s0 = inlined_call_operand.hbm [shape: f32[16,768], index: 0, kind: input, shape index: {}]   ;;  %s839_s1 = inlined_call_operand.hbm [shape: f32[1,768], index: 1, kind: input, shape index: {}]   ;;  %s840_s2 = inlined_call_operand.hbm [shape: f32[1,768], index: 2, kind: input, shape index: {}]   ;;  %s841_s3 = inlined_call_operand.hbm [shape: f32[16,768], index: 3, kind: output, shape index: {}]  }
   0x1   :  { %10 = vsyncpa [#allocation3 + $0x1], 0 }
   0x2   :  { %11 = vsyncpa [#allocation6], 0 }
   0x3   :  { %12 = vsyncpa [#allocation4], 0 }
   0x4   :  { %14 = vsyncpa [#allocation4 + $0x1], 0  ;;  %s693_s12 = smov 0   ;;  %s695_s13 = smov 0  }
   0x5   :  { %s697_s14 = smov 0   ;;  %s699_s15 = smov 0  }
   0x6 LB: > { %s714_s16 = sadd.s32 4294967295, %s669_s15   ;;  %s424_s17 = sadd.s32 4294967294, %s669_s15   ;;  %s669_s15 = sphi %s699_s15, %s851_s15   ;;  %s665_s14 = sphi %s697_s14, %s850_s14   ;;  %s661_s13 = sphi %s695_s13, %s849_s13   ;;  %s657_s12 = sphi %s693_s12, %s848_s12  }
   0x7   : > { %p40_p0 = scmp.ne.s32.totalorder %s661_s13, %s657_s12  ;;  %p41_p1 = scmp.eq.s32.totalorder %s714_s16, 0 }
   0x8   : > { %p106_p2 = scmp.eq.s32.totalorder %s714_s16, 1  ;;  %p112_p3 = scmp.eq.s32.totalorder %s424_s17, 1 }
   0x9   : > { %p723_p4 = por %p41_p1, %p40_p0  ;;  %p425_p5 = scmp.ge.s32.totalorder %s669_s15, 1 }
   0xa   : > { %p728_p6 = por %p112_p3, %p40_p0  ;;  %p119_p7 = scmp.lt.s32.totalorder %s669_s15, 3 }
   0xb   : > { %s131_s22 = sshll.u32 %s839_s1, 4  ;;  %s671_s24 = smov [#allocation5]   ;;  %s132_s22 = int_to_ptr.hbm [resolvable:$true] %s131_s22 }
   0xc   : > { %p736_p8 = pnand %p425_p5, %p119_p7  ;;  %s133_s25 = sshll.u32 %s671_s24, 4  ;;  %s134_s25 = int_to_ptr.vmem [resolvable:$true] %s133_s25 }
   0xd   : > { %s143_s28 = sshll.u32 %s840_s2, 4  ;;  %s672_s29 = smov [#allocation7]   ;;  %s144_s28 = int_to_ptr.hbm [resolvable:$true] %s143_s28 }
   0xe   : > { %p452_p10 = pneg %p736_p8  ;;  %s145_s30 = sshll.u32 %s672_s29, 4  ;;  %s146_s30 = int_to_ptr.vmem [resolvable:$true] %s145_s30 }
   0xf   : > { %s749_s4 = sadd.s32 1, %s669_s15   ;;  %s27_s5 = sadd.s32 1, %s665_s14 }
  0x10   : > { %p453_p11 = pnand %p452_p10, %p41_p1  ;;  %s24_s6 = ssub.s32 %s669_s15, %s749_s4 }
  0x11   : > { %p34_p12 = scmp.ne.s32.totalorder %s665_s14, %s661_s13  ;;  %p25_p13 = scmp.eq.s32.totalorder %s24_s6, 0 }
  0x12   : > { %455 = dma.hbm_to_vmem [thread:$0]  (!%p453_p11), %s132_s22, 96, %s134_s25, [#allocation6]  }
  0x13   : > { %458 = dma.hbm_to_vmem [thread:$0]  (!%p453_p11), %s144_s28, 96, %s146_s30, [#allocation6]  }
  0x14   : > { %p35_p0 = scmp.eq.s32.totalorder %s669_s15, 0  ;;  %p759_p3 = por %p106_p2, %p34_p12 }
  0x15   : > { %p469_p5 = scmp.lt.s32.totalorder %s669_s15, 2  ;;  %s156_s9 = sand.u32 1, %s665_s14  }
  0x16   : > { %s765_s8 = scalar_select %p25_p13, %s665_s14, %s27_s5  }
  0x17   : > { %p36_p7 = por %p35_p0, %p34_p12  ;;  %s436_s10 = smul.u32 48, %s156_s9 }
  0x18   : > { %s437_s11 = smul.u32 48, %s669_s15  ;;  %s157_s27 = scalar_lea.sflag [#allocation3], %s156_s9 }
  0x19   : > { %p769_p10 = pnand %p469_p5, %p36_p7  ;;  %s160_s24 = scalar_lea.vmem [#allocation2], %s436_s10 }
  0x1a   : > { %s165_s22 = scalar_lea.hbm %s838_s0, %s437_s11  ;;  %s169_s25 = sshll.u32 %s160_s24, 4  ;;  %s170_s25 = int_to_ptr.vmem [resolvable:$true] %s169_s25 }
  0x1b   : > { %s167_s26 = sshll.u32 %s165_s22, 4  ;;  %p573_p11 = pneg %p769_p10  ;;  %s168_s26 = int_to_ptr.hbm [resolvable:$true] %s167_s26 }
  0x1c   : > { %s569_s28 = sshra.s32 %s168_s26, 4  ;;  %s576_s6 = scalar_lea.hbm %s838_s0, 96  ;;  %s570_s28 = int_to_ptr.hbm [resolvable:$true] %s569_s28 }
  0x1d   : > { %s571_s29 = scalar_lea.hbm %s570_s28, 48  ;;  %p577_p0 = scmp.lt.s32.totalorder %s570_s28, %s838_s0 }
  0x1e   : > { %p572_p2 = scmp.ne.s32.totalorder %s570_s28, %s571_s29  ;;  %p578_p5 = scmp.lt.s32.totalorder %s576_s6, %s571_s29 }
  0x20   : > { %p574_p12 = pnand %p573_p11, %p572_p2  ;;  %p579_p7 = por %p578_p5, %p577_p0 }
  0x22   : > { %p575_p13 = pneg %p574_p12 }
  0x24   : > { %p580_p9 = pnand %p579_p7, %p575_p13 }
  0x26   : > { %583 = shalt.err (!%p580_p9)
}
  0x27   : > { %462 = dma.hbm_to_vmem [thread:$0]  (!%p769_p10), %s168_s26, 768, %s170_s25, %s157_s27  }
  0x28   : > { %178 = sbr.rel (%p736_p8) target bundleno = 223 (0xdf), region = 32  ;;  %s789_s9 = sand.u32 (!%p736_p8), 1, %s661_s13  }
  0x29   : > { %s438_s10 = smul.u32 (!%p736_p8), 48, %s789_s9  ;;  %s181_s21 = scalar_lea.sflag (!%p736_p8), [#allocation3], %s789_s9 }
  0x2b   : > { %s184_s22 = scalar_lea.vmem (!%p736_p8), [#allocation2], %s438_s10 }
  0x2d   : > { %644 = dma.done.wait (%p723_p4), %s181_s21, 768  }
  0x2e   : > { %646 = vsyncadd (%p723_p4), %s181_s21, 4294966528 }
  0x2f   : > { %648 = dma.done.wait (%p41_p1), [#allocation6], 192  }
  0x30   : > { %650 = vsyncadd (%p41_p1), [#allocation6], 4294967104  ;;  %v218_v0 = vld [vmem:[%s184_s22] sm:$0xff]  ;;  %v219_v1 = vld [vmem:[%s184_s22 + $0x8] sm:$0xff]  ;;  %s439_s18 = smul.u32 48, %s714_s16  ;;  %s217_s24 = scalar_lea.vmem [#allocation8], %s438_s10 }
  0x31   : > { %v220_v2 = vld [vmem:[%s184_s22 + $0x10] sm:$0xff]  ;;  %v224_v3 = vadd.f32 %v219_v1, %v218_v0  ;;  %v231_v4 = vmul.f32 %v218_v0, %v218_v0  ;;  %v232_v5 = vmul.f32 %v219_v1, %v219_v1  ;;  %v221_v7 = vld [vmem:[%s184_s22 + $0x18] sm:$0xff]  ;;  %v222_v11 = vld [vmem:[%s184_s22 + $0x20] sm:$0xff]  ;;  %s332_s25 = sshll.u32 %s217_s24, 4  ;;  %s319_s27 = scalar_lea.sflag [#allocation4], %s789_s9  ;;  %s333_s25 = int_to_ptr.vmem [resolvable:$true] %s332_s25 }
  0x32   : > { %v233_v6 = vmul.f32 %v220_v2, %v220_v2  ;;  %v234_v9 = vmul.f32 %v221_v7, %v221_v7  ;;  %v223_v14 = vld [vmem:[%s184_s22 + $0x28] sm:$0xff]  ;;  %v235_v16 = vmul.f32 %v222_v11, %v222_v11  ;;  %v272_v33 = vld [vmem:[#allocation5] sm:$0x3f]  ;;  %s330_s16 = scalar_lea.hbm %s841_s3, %s439_s18  ;;  %s619_s6 = scalar_lea.hbm %s841_s3, 96 }
  0x33   : > { %v225_v8 = vadd.f32 %v224_v3, %v220_v2  ;;  %v237_v10 = vadd.f32 %v232_v5, %v231_v4  ;;  %v236_v19 = vmul.f32 %v223_v14, %v223_v14  ;;  %v292_v35 = vld [vmem:[#allocation7] sm:$0x3f]  ;;  %v274_v36 = vperm.slane %v272_v33, 0  ;;  %s334_s26 = sshll.u32 %s330_s16, 4  ;;  %s335_s26 = int_to_ptr.hbm [resolvable:$true] %s334_s26 }
  0x34   : > { %v275_v37 = vperm.slane %v272_v33, 1  ;;  %v276_v39 = vperm.slane %v272_v33, 2  ;;  %v277_v40 = vperm.slane %v272_v33, 3  ;;  %v278_v41 = vperm.slane %v272_v33, 4  ;;  %s613_s28 = sshra.s32 %s335_s26, 4  ;;  %s614_s28 = int_to_ptr.hbm [resolvable:$true] %s613_s28 }
  0x35   : > { %v226_v12 = vadd.f32 %v225_v8, %v221_v7  ;;  %v238_v13 = vadd.f32 %v237_v10, %v233_v6  ;;  %v279_v42 = vperm.slane %v272_v33, 5  ;;  %v294_v43 = vperm.slane %v292_v35, 0  ;;  %s615_s29 = scalar_lea.hbm %s614_s28, 48  ;;  %p620_p9 = scmp.lt.s32.totalorder %s614_s28, %s841_s3 }
  0x36   : > { %v295_v44 = vperm.slane %v292_v35, 1  ;;  %v296_v52 = vperm.slane %v292_v35, 2  ;;  %v297_v58 = vperm.slane %v292_v35, 3  ;;  %v298_v59 = vperm.slane %v292_v35, 4  ;;  %p616_p1 = scmp.ne.s32.totalorder %s614_s28, %s615_s29  ;;  %p621_p10 = scmp.lt.s32.totalorder %s619_s6, %s615_s29 }
  0x37   : > { %v227_v15 = vadd.f32 %v226_v12, %v222_v11  ;;  %v239_v17 = vadd.f32 %v238_v13, %v234_v9 }
  0x38   : > { %p617_p4 = pnand %p616_p1, %p759_p3  ;;  %p622_p2 = por %p621_p10, %p620_p9 }
  0x39   : > { %v228_v18 = vadd.f32 %v227_v15, %v223_v14  ;;  %v240_v20 = vadd.f32 %v239_v17, %v235_v16 }
  0x3a   : > { %p618_p8 = pneg %p617_p4 }
  0x3b   : > { %229 = vadd.xlane.f32.xlu0 %v228_v18  ;;  %v241_v21 = vadd.f32 %v240_v20, %v236_v19 }
  0x3c   : > { %p623_p11 = pnand %p622_p2, %p618_p8 }
  0x43   : > { %242 = vadd.xlane.f32.xlu0 %v241_v21 }
  0xae   : > { %v230_v22 = vpop.xlane.xlu0 %229 }
  0xaf   : > { %v244_v23 = vmul.f32 0.0013020834, %v230_v22 }
  0xb1   : > { %v246_v25 = vmul.f32 %v244_v23, %v244_v23  ;;  %v260_v46 = vsub.f32 %v218_v0, %v244_v23  ;;  %v261_v47 = vsub.f32 %v219_v1, %v244_v23  ;;  %v262_v48 = vsub.f32 %v220_v2, %v244_v23 }
  0xb2   : > { %v263_v49 = vsub.f32 %v221_v7, %v244_v23  ;;  %v264_v50 = vsub.f32 %v222_v11, %v244_v23  ;;  %v265_v51 = vsub.f32 %v223_v14, %v244_v23  ;;  %v299_v2 = vperm.slane %v292_v35, 5 }
  0xb6   : > { %v243_v24 = vpop.xlane.xlu0 %242 }
  0xb7   : > { %v245_v26 = vmul.f32 0.0013020834, %v243_v24 }
  0xb9   : > { %v247_v27 = vsub.f32 %v245_v26, %v246_v25 }
  0xbb   : > { %v248_v28 = vmax.f32 %v247_v27, 0.0 }
  0xbd   : > { %v249_v29 = vadd.f32 1e-05, %v248_v28 }
  0xbf   : > { %507 = vrsqrt.f32 %v249_v29  ;;  %vm256_vm1 = vweird.f32 %v249_v29 }
  0xc5   : > { %v508_v30 = vpop.eup %507 }
  0xc6   : > { %v251_v31 = vmul.f32 %v508_v30, %v249_v29  ;;  %vm257_vm0 = vweird.f32 %v508_v30 }
  0xc7   : > { %vm258_vm2 = vmor %vm256_vm1, %vm257_vm0 }
  0xc8   : > { %v252_v32 = vmul.f32 %v508_v30, %v251_v31 }
  0xca   : > { %v253_v34 = vmul.f32 0.5, %v252_v32 }
  0xcc   : > { %v254_v38 = vsub.f32 1.5, %v253_v34 }
  0xce   : > { %v255_v45 = vmul.f32 %v508_v30, %v254_v38 }
  0xd0   : > { %v259_v53 = vsel %vm258_vm2, %v508_v30, %v255_v45 }
  0xd1   : > { %v266_v54 = vmul.f32 %v260_v46, %v259_v53  ;;  %v267_v55 = vmul.f32 %v261_v47, %v259_v53  ;;  %v268_v56 = vmul.f32 %v262_v48, %v259_v53  ;;  %v269_v57 = vmul.f32 %v263_v49, %v259_v53 }
  0xd2   : > { %v270_v60 = vmul.f32 %v264_v50, %v259_v53  ;;  %v271_v61 = vmul.f32 %v265_v51, %v259_v53 }
  0xd3   : > { %v286_v62 = vmul.f32 %v274_v36, %v266_v54  ;;  %v287_v63 = vmul.f32 %v275_v37, %v267_v55  ;;  %v288_v0 = vmul.f32 %v276_v39, %v268_v56  ;;  %v289_v1 = vmul.f32 %v277_v40, %v269_v57 }
  0xd4   : > { %v290_v3 = vmul.f32 %v278_v41, %v270_v60  ;;  %v291_v4 = vmul.f32 %v279_v42, %v271_v61 }
  0xd5   : > { %v306_v5 = vadd.f32 %v294_v43, %v286_v62  ;;  %v307_v6 = vadd.f32 %v295_v44, %v287_v63  ;;  %v308_v7 = vadd.f32 %v296_v52, %v288_v0  ;;  %v309_v8 = vadd.f32 %v297_v58, %v289_v1 }
  0xd6   : > { %v310_v9 = vadd.f32 %v298_v59, %v290_v3  ;;  %v311_v10 = vadd.f32 %v299_v2, %v291_v4 }
  0xd7   : > { %312 = vst [vmem:[%s217_s24] sm:$0xff] %v306_v5 }
  0xd8   : > { %313 = vst [vmem:[%s217_s24 + $0x8] sm:$0xff] %v307_v6 }
  0xd9   : > { %314 = vst [vmem:[%s217_s24 + $0x10] sm:$0xff] %v308_v7 }
  0xda   : > { %315 = vst [vmem:[%s217_s24 + $0x18] sm:$0xff] %v309_v8 }
  0xdb   : > { %316 = vst [vmem:[%s217_s24 + $0x20] sm:$0xff] %v310_v9 }
  0xdc   : > { %317 = vst [vmem:[%s217_s24 + $0x28] sm:$0xff] %v311_v10 }
  0xdd   : > { %626 = shalt.err (!%p623_p11)
}
  0xde   : > { %450 = dma.vmem_to_hbm [thread:$0]  (%p759_p3), %s333_s25, 768, %s335_s26, %s319_s27  }
  0xdf PF: > { %s346_s9 = sand.u32 1, %s657_s12   ;;  %p847_p12 = scmp.ge.s32.totalorder %s669_s15, 2 }
  0xe0   : > { %s347_s10 = scalar_lea.sflag [#allocation4], %s346_s9 }
  0xe1   : > { %p464_p13 = pnand %p847_p12, %p728_p6 }
  0xe3   : > { %p465_p0 = pneg %p464_p13 }
  0xe5   : > { %652 = dma.done.wait (%p465_p0), %s347_s10, 768  }
  0xe6   : > { %654 = vsyncadd (%p465_p0), %s347_s10, 4294966528  ;;  %p17_p5 = scmp.ge.s32.totalorder %s749_s4, 4   ;;  %s848_s12 = smov %s661_s13 }
  0xe7   : > { %s849_s13 = smov %s665_s14  ;;  %s850_s14 = smov %s765_s8 }
  0xe8   : > { %s851_s15 = smov %s749_s4  ;;  %19 = sbr.rel (!%p17_p5) target bundleno = 6 (0x6), region = 85 }
  0xed   :  { %353 = vsyncpa [#allocation3], 1 }
  0xee   :  { %355 = vsyncpa [#allocation3 + $0x1], 1 }
  0xef   :  { %356 = vsyncpa [#allocation6], 1 }
  0xf0   :  { %357 = vsyncpa [#allocation4], 1 }
  0xf1   :  { %359 = vsyncpa [#allocation4 + $0x1], 1 }

</bundles_post_ra>
